<compile_context>
chip_gen: v7x
topology: tpu7x:2x2x1
jax: 0.10.0
libtpu: 0.0.40
codegen_flags: <defaults>
</compile_context>

<pallas_src>
import math

import jax
import jax.numpy as jnp
from jax import lax
from jax.experimental import pallas as pl
from jax.experimental.pallas import tpu as pltpu

# ----------------------------- configuration --------------------------------
BATCH = 2
SEQ = 8
D_MODEL = 32
NUM_HEADS = 4
HEAD_DIM = D_MODEL // NUM_HEADS
BS = BATCH * SEQ

assert SEQ & (SEQ - 1) == 0, "SEQ must be a power of two for the shift-based batch id"
SEQ_SHIFT = SEQ.bit_length() - 1


# ------------------------------- kernel -------------------------------------
def mha_kernel(
    x_ref,      # (B*S, D)    = (16, 32)
    wqkv_ref,   # (D, 3D)     = (32, 96)   columns ordered (3, H, hd) like the torch reshape
    bqkv_ref,   # (1, 3D)     = (1, 96)
    wout_ref,   # (D, D)      = (32, 32)
    bout_ref,   # (1, D)      = (1, 32)
    o_ref,      # (B*S, D)    = (16, 32)
):
    x = x_ref[...]                                               # (16, 32) f32

    # Fused QKV projection: one MXU matmul + one lane-dense bias add.
    qkv = (jnp.dot(x, wqkv_ref[...], preferred_element_type=jnp.float32)
           + bqkv_ref[...])                                      # (16, 96)

    scale = 1.0 / math.sqrt(HEAD_DIM)
    q_all = qkv[:, 0 * D_MODEL:1 * D_MODEL] * scale              # scale folded into q once
    k_all = qkv[:, 1 * D_MODEL:2 * D_MODEL]
    v_all = qkv[:, 2 * D_MODEL:3 * D_MODEL]

    # Block-diagonal (per-batch) causal additive bias over the flattened B*S axis,
    # built in-kernel from two iotas (no extra operand / DMA).
    r = lax.broadcasted_iota(jnp.int32, (BS, BS), 0)
    c = lax.broadcasted_iota(jnp.int32, (BS, BS), 1)
    same_batch = lax.shift_right_logical(r, SEQ_SHIFT) == lax.shift_right_logical(c, SEQ_SHIFT)
    keep = jnp.logical_and(same_batch, r >= c)
    bias = jnp.where(keep, jnp.float32(0.0), jnp.float32(-1e30)) # (16, 16)

    ctx_parts = []
    for h in range(NUM_HEADS):                                   # static unroll, H = 4
        lo = h * HEAD_DIM
        hi = lo + HEAD_DIM
        q = q_all[:, lo:hi]                                      # (16, hd) lane slices
        k = k_all[:, lo:hi]
        v = v_all[:, lo:hi]

        s = jnp.dot(q, k.T, preferred_element_type=jnp.float32) + bias   # (16, 16)
        s = s - jnp.max(s, axis=-1, keepdims=True)               # diag always unmasked -> safe
        p = jnp.exp(s)
        p = p * pl.reciprocal(jnp.sum(p, axis=-1, keepdims=True), approx=True)
        ctx_parts.append(jnp.dot(p, v, preferred_element_type=jnp.float32))   # (16, hd)

    # Head merge: lane concat to (16, 32), then ONE (16,32)@(32,32) output matmul.
    ctx_all = jnp.concatenate(ctx_parts, axis=1)                 # head-major columns
    o_ref[...] = (jnp.dot(ctx_all, wout_ref[...], preferred_element_type=jnp.float32)
                  + bout_ref[...])


# ------------------------------- wrapper -------------------------------------
_FLOPS = (2 * BS * D_MODEL * 3 * D_MODEL                         # qkv projection
          + NUM_HEADS * (2 * BS * HEAD_DIM * BS + 2 * BS * BS * HEAD_DIM)  # qk^T + pv
          + 2 * BS * D_MODEL * D_MODEL)                          # output projection
_TRANSCENDENTALS = NUM_HEADS * BS * BS + NUM_HEADS * BS          # exp + reciprocal
_BYTES = 4 * (BS * D_MODEL + D_MODEL * 3 * D_MODEL + 3 * D_MODEL
              + D_MODEL * D_MODEL + D_MODEL + BS * D_MODEL)


@jax.jit
def mha_forward(x, params):
    B, S, D = x.shape

    vmem_spec = pl.BlockSpec(memory_space=pltpu.MemorySpace.VMEM)
    out_flat = pl.pallas_call(
        mha_kernel,
        out_shape=jax.ShapeDtypeStruct((B * S, D), jnp.float32),
        in_specs=[vmem_spec] * 5,
        out_specs=vmem_spec,
        cost_estimate=pl.CostEstimate(
            flops=_FLOPS, transcendentals=_TRANSCENDENTALS, bytes_accessed=_BYTES),
    )(
        x.reshape(B * S, D),
        params["wqkv"],
        params["bqkv"].reshape(1, 3 * D),
        params["wout"],
        params["bout"].reshape(1, D),
    )
    return out_flat.reshape(B, S, D)


# --------------------------- param initialization ----------------------------
def init_params(key, d_model):
    k0, k1, k2, k3 = jax.random.split(key, 4)
    std = 0.02
    return {
        # (in_features, out_features) convention: y = x @ W + b
        "wqkv": jax.random.normal(k0, (d_model, 3 * d_model), jnp.float32) * std,
        "bqkv": jax.random.normal(k1, (3 * d_model,), jnp.float32) * std,
        "wout": jax.random.normal(k2, (d_model, d_model), jnp.float32) * std,
        "bout": jax.random.normal(k3, (d_model,), jnp.float32) * std,
    }


# pure-JAX reference (mirrors the PyTorch forward, mask=None, causal softmax)
def reference(x, p):
    B, S, D = x.shape
    H, hd = NUM_HEADS, HEAD_DIM
    qkv = x @ p["wqkv"] + p["bqkv"]
    qkv = qkv.reshape(B, S, 3, H, hd).transpose(2, 0, 3, 1, 4)
    q, k, v = qkv[0], qkv[1], qkv[2]                        # (B, H, S, hd)
    s = jnp.einsum("bhqd,bhkd->bhqk", q, k) * (hd ** -0.5)
    causal = jnp.tril(jnp.ones((S, S), bool))
    s = jnp.where(causal, s, -jnp.inf)
    a = jax.nn.softmax(s, axis=-1)
    o = jnp.einsum("bhqk,bhkd->bhqd", a, v).transpose(0, 2, 1, 3).reshape(B, S, D)
    return o @ p["wout"] + p["bout"]


if __name__ == "__main__":
    key = jax.random.PRNGKey(0)
    kx, kp = jax.random.split(key)
    x = jax.random.normal(kx, (BATCH, SEQ, D_MODEL), jnp.float32)
    params = init_params(kp, D_MODEL)

    out = jax.block_until_ready(mha_forward(x, params))
    ref = reference(x, params)

    assert out.shape == (BATCH, SEQ, D_MODEL)
    # tolerance leaves headroom for pl.reciprocal(approx=True) (~2^-12 rel err)
    assert jnp.allclose(out, ref, atol=5e-4, rtol=5e-4), "mismatch vs JAX reference"

    print("KERNEL_OK")
</pallas_src>

<mosaic_0001>
module attributes {stable_mosaic.version = 11 : i64} {
  func.func @mha_kernel(%arg0: memref<16x32xf32, #tpu.memory_space<vmem>>, %arg1: memref<32x96xf32, #tpu.memory_space<vmem>>, %arg2: memref<1x96xf32, #tpu.memory_space<vmem>>, %arg3: memref<32x32xf32, #tpu.memory_space<vmem>>, %arg4: memref<1x32xf32, #tpu.memory_space<vmem>>, %arg5: memref<16x32xf32, #tpu.memory_space<vmem>>) attributes {dimension_semantics = [], scalar_prefetch = 0 : i64, scratch_operands = 0 : i64, tpu.core_type = #tpu.core_type<tc>} {
    %c0 = arith.constant 0 : index
    %c0_0 = arith.constant 0 : index
    %0 = vector.load %arg0[%c0, %c0_0] : memref<16x32xf32, #tpu.memory_space<vmem>>, vector<16x32xf32>
    %c0_1 = arith.constant 0 : index
    %c0_2 = arith.constant 0 : index
    %1 = vector.load %arg1[%c0_1, %c0_2] : memref<32x96xf32, #tpu.memory_space<vmem>>, vector<32x96xf32>
    %cst = arith.constant dense<0.000000e+00> : vector<16x96xf32>
    %2 = tpu.matmul %0, %1, %cst {dimension_numbers = #tpu.dot_dimension_numbers<[1], [0], [0], [1], [0, 0, 1, 1], [], []>} : vector<16x32xf32>, vector<32x96xf32>, vector<16x96xf32> -> vector<16x96xf32>
    %c0_3 = arith.constant 0 : index
    %c0_4 = arith.constant 0 : index
    %3 = vector.load %arg2[%c0_3, %c0_4] : memref<1x96xf32, #tpu.memory_space<vmem>>, vector<1x96xf32>
    %4 = vector.broadcast %3 : vector<1x96xf32> to vector<16x96xf32>
    %5 = arith.addf %2, %4 : vector<16x96xf32>
    %6 = vector.extract_strided_slice %5 {offsets = [0, 0], sizes = [16, 32], strides = [1, 1]} : vector<16x96xf32> to vector<16x32xf32>
    %cst_5 = arith.constant 0.353553385 : f32
    %7 = vector.broadcast %cst_5 : f32 to vector<16x32xf32>
    %8 = arith.mulf %6, %7 : vector<16x32xf32>
    %9 = vector.extract_strided_slice %5 {offsets = [0, 32], sizes = [16, 32], strides = [1, 1]} : vector<16x96xf32> to vector<16x32xf32>
    %10 = vector.extract_strided_slice %5 {offsets = [0, 64], sizes = [16, 32], strides = [1, 1]} : vector<16x96xf32> to vector<16x32xf32>
    %11 = tpu.iota {dimensions = array<i32: 0>} : vector<16x16xi32>
    %12 = tpu.iota {dimensions = array<i32: 1>} : vector<16x16xi32>
    %c3_i32 = arith.constant 3 : i32
    %13 = vector.broadcast %c3_i32 : i32 to vector<16x16xi32>
    %14 = arith.shrui %11, %13 : vector<16x16xi32>
    %c3_i32_6 = arith.constant 3 : i32
    %15 = vector.broadcast %c3_i32_6 : i32 to vector<16x16xi32>
    %16 = arith.shrui %12, %15 : vector<16x16xi32>
    %17 = arith.cmpi eq, %14, %16 : vector<16x16xi32>
    %18 = arith.cmpi sge, %11, %12 : vector<16x16xi32>
    %19 = arith.andi %17, %18 : vector<16x16xi1>
    %cst_7 = arith.constant 0.000000e+00 : f32
    %cst_8 = arith.constant -1.000000e+30 : f32
    %20 = vector.broadcast %cst_7 : f32 to vector<16x16xf32>
    %21 = vector.broadcast %cst_8 : f32 to vector<16x16xf32>
    %22 = arith.select %19, %20, %21 : vector<16x16xi1>, vector<16x16xf32>
    %23 = vector.extract_strided_slice %8 {offsets = [0, 0], sizes = [16, 8], strides = [1, 1]} : vector<16x32xf32> to vector<16x8xf32>
    %24 = vector.extract_strided_slice %9 {offsets = [0, 0], sizes = [16, 8], strides = [1, 1]} : vector<16x32xf32> to vector<16x8xf32>
    %25 = vector.extract_strided_slice %10 {offsets = [0, 0], sizes = [16, 8], strides = [1, 1]} : vector<16x32xf32> to vector<16x8xf32>
    %26 = tpu.transpose %24, [1, 0] : vector<16x8xf32> -> vector<8x16xf32>
    %cst_9 = arith.constant dense<0.000000e+00> : vector<16x16xf32>
    %27 = tpu.matmul %23, %26, %cst_9 {dimension_numbers = #tpu.dot_dimension_numbers<[1], [0], [0], [1], [0, 0, 1, 1], [], []>} : vector<16x8xf32>, vector<8x16xf32>, vector<16x16xf32> -> vector<16x16xf32>
    %28 = arith.addf %27, %22 : vector<16x16xf32>
    %cst_10 = arith.constant dense<0xFF800000> : vector<16xf32>
    %29 = vector.multi_reduction <maximumf>, %28, %cst_10 [1] : vector<16x16xf32> to vector<16xf32>
    %30 = vector.shape_cast %29 : vector<16xf32> to vector<16x1xf32>
    %31 = vector.broadcast %30 : vector<16x1xf32> to vector<16x16xf32>
    %32 = arith.subf %28, %31 : vector<16x16xf32>
    %33 = math.exp %32 : vector<16x16xf32>
    %cst_11 = arith.constant dense<0.000000e+00> : vector<16xf32>
    %34 = vector.multi_reduction <add>, %33, %cst_11 [1] : vector<16x16xf32> to vector<16xf32>
    %35 = vector.shape_cast %34 : vector<16xf32> to vector<16x1xf32>
    %36 = tpu.reciprocal %35 {approx = true} : vector<16x1xf32> -> vector<16x1xf32>
    %37 = vector.broadcast %36 : vector<16x1xf32> to vector<16x16xf32>
    %38 = arith.mulf %33, %37 : vector<16x16xf32>
    %cst_12 = arith.constant dense<0.000000e+00> : vector<16x8xf32>
    %39 = tpu.matmul %38, %25, %cst_12 {dimension_numbers = #tpu.dot_dimension_numbers<[1], [0], [0], [1], [0, 0, 1, 1], [], []>} : vector<16x16xf32>, vector<16x8xf32>, vector<16x8xf32> -> vector<16x8xf32>
    %40 = vector.extract_strided_slice %8 {offsets = [0, 8], sizes = [16, 8], strides = [1, 1]} : vector<16x32xf32> to vector<16x8xf32>
    %41 = vector.extract_strided_slice %9 {offsets = [0, 8], sizes = [16, 8], strides = [1, 1]} : vector<16x32xf32> to vector<16x8xf32>
    %42 = vector.extract_strided_slice %10 {offsets = [0, 8], sizes = [16, 8], strides = [1, 1]} : vector<16x32xf32> to vector<16x8xf32>
    %43 = tpu.transpose %41, [1, 0] : vector<16x8xf32> -> vector<8x16xf32>
    %cst_13 = arith.constant dense<0.000000e+00> : vector<16x16xf32>
    %44 = tpu.matmul %40, %43, %cst_13 {dimension_numbers = #tpu.dot_dimension_numbers<[1], [0], [0], [1], [0, 0, 1, 1], [], []>} : vector<16x8xf32>, vector<8x16xf32>, vector<16x16xf32> -> vector<16x16xf32>
    %45 = arith.addf %44, %22 : vector<16x16xf32>
    %cst_14 = arith.constant dense<0xFF800000> : vector<16xf32>
    %46 = vector.multi_reduction <maximumf>, %45, %cst_14 [1] : vector<16x16xf32> to vector<16xf32>
    %47 = vector.shape_cast %46 : vector<16xf32> to vector<16x1xf32>
    %48 = vector.broadcast %47 : vector<16x1xf32> to vector<16x16xf32>
    %49 = arith.subf %45, %48 : vector<16x16xf32>
    %50 = math.exp %49 : vector<16x16xf32>
    %cst_15 = arith.constant dense<0.000000e+00> : vector<16xf32>
    %51 = vector.multi_reduction <add>, %50, %cst_15 [1] : vector<16x16xf32> to vector<16xf32>
    %52 = vector.shape_cast %51 : vector<16xf32> to vector<16x1xf32>
    %53 = tpu.reciprocal %52 {approx = true} : vector<16x1xf32> -> vector<16x1xf32>
    %54 = vector.broadcast %53 : vector<16x1xf32> to vector<16x16xf32>
    %55 = arith.mulf %50, %54 : vector<16x16xf32>
    %cst_16 = arith.constant dense<0.000000e+00> : vector<16x8xf32>
    %56 = tpu.matmul %55, %42, %cst_16 {dimension_numbers = #tpu.dot_dimension_numbers<[1], [0], [0], [1], [0, 0, 1, 1], [], []>} : vector<16x16xf32>, vector<16x8xf32>, vector<16x8xf32> -> vector<16x8xf32>
    %57 = vector.extract_strided_slice %8 {offsets = [0, 16], sizes = [16, 8], strides = [1, 1]} : vector<16x32xf32> to vector<16x8xf32>
    %58 = vector.extract_strided_slice %9 {offsets = [0, 16], sizes = [16, 8], strides = [1, 1]} : vector<16x32xf32> to vector<16x8xf32>
    %59 = vector.extract_strided_slice %10 {offsets = [0, 16], sizes = [16, 8], strides = [1, 1]} : vector<16x32xf32> to vector<16x8xf32>
    %60 = tpu.transpose %58, [1, 0] : vector<16x8xf32> -> vector<8x16xf32>
    %cst_17 = arith.constant dense<0.000000e+00> : vector<16x16xf32>
    %61 = tpu.matmul %57, %60, %cst_17 {dimension_numbers = #tpu.dot_dimension_numbers<[1], [0], [0], [1], [0, 0, 1, 1], [], []>} : vector<16x8xf32>, vector<8x16xf32>, vector<16x16xf32> -> vector<16x16xf32>
    %62 = arith.addf %61, %22 : vector<16x16xf32>
    %cst_18 = arith.constant dense<0xFF800000> : vector<16xf32>
    %63 = vector.multi_reduction <maximumf>, %62, %cst_18 [1] : vector<16x16xf32> to vector<16xf32>
    %64 = vector.shape_cast %63 : vector<16xf32> to vector<16x1xf32>
    %65 = vector.broadcast %64 : vector<16x1xf32> to vector<16x16xf32>
    %66 = arith.subf %62, %65 : vector<16x16xf32>
    %67 = math.exp %66 : vector<16x16xf32>
    %cst_19 = arith.constant dense<0.000000e+00> : vector<16xf32>
    %68 = vector.multi_reduction <add>, %67, %cst_19 [1] : vector<16x16xf32> to vector<16xf32>
    %69 = vector.shape_cast %68 : vector<16xf32> to vector<16x1xf32>
    %70 = tpu.reciprocal %69 {approx = true} : vector<16x1xf32> -> vector<16x1xf32>
    %71 = vector.broadcast %70 : vector<16x1xf32> to vector<16x16xf32>
    %72 = arith.mulf %67, %71 : vector<16x16xf32>
    %cst_20 = arith.constant dense<0.000000e+00> : vector<16x8xf32>
    %73 = tpu.matmul %72, %59, %cst_20 {dimension_numbers = #tpu.dot_dimension_numbers<[1], [0], [0], [1], [0, 0, 1, 1], [], []>} : vector<16x16xf32>, vector<16x8xf32>, vector<16x8xf32> -> vector<16x8xf32>
    %74 = vector.extract_strided_slice %8 {offsets = [0, 24], sizes = [16, 8], strides = [1, 1]} : vector<16x32xf32> to vector<16x8xf32>
    %75 = vector.extract_strided_slice %9 {offsets = [0, 24], sizes = [16, 8], strides = [1, 1]} : vector<16x32xf32> to vector<16x8xf32>
    %76 = vector.extract_strided_slice %10 {offsets = [0, 24], sizes = [16, 8], strides = [1, 1]} : vector<16x32xf32> to vector<16x8xf32>
    %77 = tpu.transpose %75, [1, 0] : vector<16x8xf32> -> vector<8x16xf32>
    %cst_21 = arith.constant dense<0.000000e+00> : vector<16x16xf32>
    %78 = tpu.matmul %74, %77, %cst_21 {dimension_numbers = #tpu.dot_dimension_numbers<[1], [0], [0], [1], [0, 0, 1, 1], [], []>} : vector<16x8xf32>, vector<8x16xf32>, vector<16x16xf32> -> vector<16x16xf32>
    %79 = arith.addf %78, %22 : vector<16x16xf32>
    %cst_22 = arith.constant dense<0xFF800000> : vector<16xf32>
    %80 = vector.multi_reduction <maximumf>, %79, %cst_22 [1] : vector<16x16xf32> to vector<16xf32>
    %81 = vector.shape_cast %80 : vector<16xf32> to vector<16x1xf32>
    %82 = vector.broadcast %81 : vector<16x1xf32> to vector<16x16xf32>
    %83 = arith.subf %79, %82 : vector<16x16xf32>
    %84 = math.exp %83 : vector<16x16xf32>
    %cst_23 = arith.constant dense<0.000000e+00> : vector<16xf32>
    %85 = vector.multi_reduction <add>, %84, %cst_23 [1] : vector<16x16xf32> to vector<16xf32>
    %86 = vector.shape_cast %85 : vector<16xf32> to vector<16x1xf32>
    %87 = tpu.reciprocal %86 {approx = true} : vector<16x1xf32> -> vector<16x1xf32>
    %88 = vector.broadcast %87 : vector<16x1xf32> to vector<16x16xf32>
    %89 = arith.mulf %84, %88 : vector<16x16xf32>
    %cst_24 = arith.constant dense<0.000000e+00> : vector<16x8xf32>
    %90 = tpu.matmul %89, %76, %cst_24 {dimension_numbers = #tpu.dot_dimension_numbers<[1], [0], [0], [1], [0, 0, 1, 1], [], []>} : vector<16x16xf32>, vector<16x8xf32>, vector<16x8xf32> -> vector<16x8xf32>
    %91 = tpu.concatenate %39, %56, %73, %90 in 1 : vector<16x8xf32>, vector<16x8xf32>, vector<16x8xf32>, vector<16x8xf32> -> vector<16x32xf32>
    %c0_25 = arith.constant 0 : index
    %c0_26 = arith.constant 0 : index
    %92 = vector.load %arg3[%c0_25, %c0_26] : memref<32x32xf32, #tpu.memory_space<vmem>>, vector<32x32xf32>
    %cst_27 = arith.constant dense<0.000000e+00> : vector<16x32xf32>
    %93 = tpu.matmul %91, %92, %cst_27 {dimension_numbers = #tpu.dot_dimension_numbers<[1], [0], [0], [1], [0, 0, 1, 1], [], []>} : vector<16x32xf32>, vector<32x32xf32>, vector<16x32xf32> -> vector<16x32xf32>
    %c0_28 = arith.constant 0 : index
    %c0_29 = arith.constant 0 : index
    %94 = vector.load %arg4[%c0_28, %c0_29] : memref<1x32xf32, #tpu.memory_space<vmem>>, vector<1x32xf32>
    %95 = vector.broadcast %94 : vector<1x32xf32> to vector<16x32xf32>
    %96 = arith.addf %93, %95 : vector<16x32xf32>
    %c0_30 = arith.constant 0 : index
    %c0_31 = arith.constant 0 : index
    %97 = vector.load %arg5[%c0_30, %c0_31] : memref<16x32xf32, #tpu.memory_space<vmem>>, vector<16x32xf32>
    tpu.vector_store %arg5[%c0_30, %c0_31], %96 {strides = array<i32>} : memref<16x32xf32, #tpu.memory_space<vmem>>, vector<16x32xf32>,
    return
  }
}

</mosaic_0001>

<bundles_post_ra>
// kernel: mha_forward.1
= control target key start
LH: loop header
LB: loop body
LE: loop exit
PB: predicated region body
PF: predicated region fallthrough
CT: control target
= control target key end

     0   :  { %10 = vsyncpa [#allocation3], 0  ;;  %s1749_s0 = inlined_call_operand.hbm [shape: f32[16,32], index: 0, kind: input, shape index: {}]   ;;  %s1750_s1 = inlined_call_operand.hbm [shape: f32[32,96], index: 1, kind: input, shape index: {}]   ;;  %s1751_s2 = inlined_call_operand.vmem [shape: f32[1,96], index: 2, kind: input, shape index: {}]   ;;  %s1752_s3 = inlined_call_operand.hbm [shape: f32[32,32], index: 3, kind: input, shape index: {}]   ;;  %s1753_s4 = inlined_call_operand.vmem [shape: f32[1,32], index: 4, kind: input, shape index: {}]   ;;  %s1754_s5 = inlined_call_operand.hbm [shape: f32[16,32], index: 5, kind: output, shape index: {}]  }
   0x1   :  { %11 = vsyncpa [#allocation6], 0 }
   0x2   :  { %12 = vsyncpa [#allocation4], 0  ;;  %s1514_s18 = smov [#allocation5]   ;;  %s1515_s20 = smov [#allocation2]  }
   0x3   :  { %s30_s19 = sshll.u32 %s1514_s18, 4  ;;  %s18_s21 = sshll.u32 %s1515_s20, 4  ;;  %s31_s19 = int_to_ptr.vmem [resolvable:$true] %s30_s19  ;;  %s1564_s21 = int_to_ptr.vmem [resolvable:$true] %s18_s21 }
   0x4   :  { %s1420_s24 = scalar_lea.hbm %s1750_s1, 512 }
   0x5   :  { %p1421_p0 = scmp.ne.s32.totalorder %s1750_s1, %s1420_s24  ;;  %p1424_p1 = scmp.lt.u32.totalorder %s1420_s24, %s1750_s1 }
   0x7   :  { %p1426_p2 = pnand %p1424_p1, %p1421_p0 }
   0x9   :  { %1429 = shalt.err (!%p1426_p2)
}
   0xa   :  { %s1430_s29 = scalar_lea.vmem %s31_s19, 512  ;;  %p1435_p4 = scmp.lt.s32.totalorder %s31_s19, %s31_s19 }
   0xb   :  { %p1431_p3 = scmp.ne.s32.totalorder %s31_s19, %s1430_s29  ;;  %p1436_p5 = scmp.lt.s32.totalorder %s1430_s29, %s1430_s29 }
   0xd   :  { %p1437_p6 = por %p1436_p5, %p1435_p4 }
   0xf   :  { %p1438_p7 = pnand %p1437_p6, %p1431_p3 }
  0x11   :  { %1441 = shalt.err (!%p1438_p7)
}
  0x12   :  { %s1516_s30 = smov 128   ;;  %s1517_s6 = smov 8  }
  0x13   :  { %36 = dma.hbm_to_vmem [thread:$0]  %s1750_s1, 512, %s31_s19, [#allocation6], %s1516_s30, %s1516_s30, %s1517_s6  }
  0x14   :  { %s1442_s11 = scalar_lea.hbm %s1749_s0, 256 }
  0x15   :  { %p1443_p8 = scmp.ne.s32.totalorder %s1749_s0, %s1442_s11  ;;  %p1446_p9 = scmp.lt.u32.totalorder %s1442_s11, %s1749_s0 }
  0x17   :  { %p1448_p10 = pnand %p1446_p9, %p1443_p8 }
  0x19   :  { %1451 = shalt.err (!%p1448_p10)
}
  0x1a   :  { %s1452_s16 = scalar_lea.vmem %s1564_s21, 256  ;;  %p1457_p12 = scmp.lt.s32.totalorder %s1564_s21, %s1564_s21 }
  0x1b   :  { %p1453_p11 = scmp.ne.s32.totalorder %s1564_s21, %s1452_s16  ;;  %p1458_p13 = scmp.lt.s32.totalorder %s1452_s16, %s1452_s16 }
  0x1d   :  { %p1459_p0 = por %p1458_p13, %p1457_p12 }
  0x1f   :  { %p1460_p1 = pnand %p1459_p0, %p1453_p11 }
  0x21   :  { %1463 = shalt.err (!%p1460_p1)
}
  0x22   :  { %24 = dma.hbm_to_vmem [thread:$0]  %s1749_s0, 256, %s1564_s21, [#allocation3], %s1516_s30, %s1516_s30, %s1517_s6  }
  0x23   :  { %s1518_s18 = smov [#allocation7]   ;;  %s1464_s23 = scalar_lea.hbm %s1752_s3, 512 }
  0x24   :  { %s44_s19 = sshll.u32 %s1518_s18, 4  ;;  %p1465_p2 = scmp.ne.s32.totalorder %s1752_s3, %s1464_s23  ;;  %s45_s19 = int_to_ptr.vmem [resolvable:$true] %s44_s19 }
  0x25   :  { %p1468_p3 = scmp.lt.u32.totalorder %s1464_s23, %s1752_s3 }
  0x27   :  { %p1470_p4 = pnand %p1468_p3, %p1465_p2 }
  0x29   :  { %1473 = shalt.err (!%p1470_p4)
}
  0x2a   :  { %s1474_s28 = scalar_lea.vmem %s45_s19, 512  ;;  %p1479_p6 = scmp.lt.s32.totalorder %s45_s19, %s45_s19 }
  0x2b   :  { %p1475_p5 = scmp.ne.s32.totalorder %s45_s19, %s1474_s28  ;;  %p1480_p7 = scmp.lt.s32.totalorder %s1474_s28, %s1474_s28 }
  0x2d   :  { %p1481_p8 = por %p1480_p7, %p1479_p6 }
  0x2f   :  { %p1482_p9 = pnand %p1481_p8, %p1475_p5 }
  0x31   :  { %1485 = shalt.err (!%p1482_p9)
}
  0x32   :  { %50 = dma.hbm_to_vmem [thread:$0]  %s1752_s3, 512, %s45_s19, [#allocation6], %s1516_s30, %s1516_s30, %s1517_s6  }
  0x33   :  { %1508 = dma.done.wait [#allocation3], 256  }
  0x34   :  { %1509 = vsyncadd [#allocation3], 4294967040 }
  0x35   :  { %1510 = dma.done.wait [#allocation6], 1024  }
  0x36   :  { %1511 = vsyncadd [#allocation6], 4294966272  ;;  %vm75_vm0 = vcmask 261120   ;;  %v64_v0 = vld [vmem:[#allocation5] sm:$0xff]  ;;  %v65_v1 = vld [vmem:[#allocation5 + $0x8] sm:$0xff]  ;;  %vm181_vm1 = vcmask 64512   ;;  %v159_v21 = vlaneseq }
  0x37   :  { %v66_v2 = vld [vmem:[#allocation5 + $0x10] sm:$0xff]  ;;  %v1272_v3 = vpack.c.bf16 %v65_v1, %v64_v0  ;;  %v67_v4 = vld [vmem:[#allocation5 + $0x18] sm:$0xff]  ;;  %s1519_s7 = smov 96   ;;  %vm1630_vm2 = vmpackc.low %vm181_vm1, %vm181_vm1  ;;  %v1520_v28 = vmov -1e+30   ;;  %vm267_vm9 = vcmask 130048  }
  0x38   :  { %v62_v5 = vld [vmem:[#allocation2] sm:$0xff]  ;;  %v1276_v6 = vpack.c.bf16 %v67_v4, %v66_v2  ;;  %v63_v7 = vld [vmem:[#allocation2 + $0x8] sm:$0xff]  ;;  %v160_v22 = vshrl.u32 %v159_v21, 7  ;;  %v163_v24 = vand.u32 127, %v159_v21  ;;  %s1522_s8 = smov 88   ;;  %s1523_s9 = smov 120  }
  0x39   :  { %1202 = vmatprep.mubr.msk.f32.mxu0 %vm75_vm0, %v62_v5  ;;  %1273 = vmatprep.subr.bf16.mxu0 %v1272_v3  ;;  %v1120_v8 = vld [vmem:[%s1751_s2] ss:$0 sm:$0xff]  ;;  %s1521_s2 = smov 64   ;;  %s1524_s10 = smov 56   ;;  %vm1005_vm10 = vcmask 195584  }
  0x3a   :  { %1275 = vmatpush3.bf16.msra.mxu0 %v1272_v3  ;;  %v161_v23 = vadd.s32 8, %v160_v22  ;;  %v166_v26 = vshrl.u32 %v163_v24, 3  ;;  %v164_v27 = vshrl.u32 %v160_v22, 3  ;;  %vm169_vm6 = vcmp.ge.s32.totalorder %v160_v22, %v163_v24  ;;  %s1525_s11 = smov 80   ;;  %s1526_s12 = smov 112  }
  0x3b   :  { %1277 = vmatprep.subr.bf16.mxu0 %v1276_v6  ;;  %s1527_s13 = smov 72   ;;  %s1528_s14 = smov 104  }
  0x3c   :  { %v165_v25 = vshrl.u32 %v161_v23, 3  ;;  %vm170_vm4 = vcmp.ge.s32.totalorder %v161_v23, %v163_v24  ;;  %vm167_vm5 = vcmp.eq.s32.totalorder %v164_v27, %v166_v26  ;;  %s1529_s15 = smov 48   ;;  %s1530_s16 = smov 40  }
  0x3d   :  { %vm171_vm8 = vmand %vm167_vm5, %vm169_vm6  ;;  %s1531_s1 = smov 16   ;;  %s1532_s17 = smov 24  }
  0x3e   :  { %1279 = vmatpush3.bf16.msra.mxu0 %v1276_v6  ;;  %vm168_vm3 = vcmp.eq.s32.totalorder %v165_v25, %v166_v26  ;;  %v1644_v30 = vsel %vm171_vm8, 0.0, %v1520_v28  ;;  %s1533_s20 = smov [#allocation8]  }
  0x3f   :  { %vm172_vm7 = vmand %vm168_vm3, %vm170_vm4  ;;  %s1107_s22 = sshll.u32 %s1533_s20, 4  ;;  %s1108_s22 = int_to_ptr.vmem [resolvable:$true] %s1107_s22 }
  0x40   :  { %v1642_v29 = vsel %vm172_vm7, 0.0, %v1520_v28  ;;  %s1486_s23 = scalar_lea.vmem %s1108_s22, 256  ;;  %p1491_p11 = scmp.lt.s32.totalorder %s1108_s22, %s1108_s22 }
  0x41   :  { %1203 = vmatmul.mubr.msk.f32.vlgmr.msra.gmra.mrb[0].mxu0 %vm75_vm0, %v63_v7  ;;  %p1487_p10 = scmp.ne.s32.totalorder %s1108_s22, %s1486_s23  ;;  %p1492_p12 = scmp.lt.s32.totalorder %s1486_s23, %s1486_s23 }
  0x43   :  { %p1493_p13 = por %p1492_p12, %p1491_p11 }
  0x45   :  { %p1494_p0 = pnand %p1493_p13, %p1487_p10 }
 0x114   :  { %v1204_v9 = vpop.f32.mrb[0].mxu0 }
 0x115   :  { %v154_v10 = vadd.f32 %v1204_v9, %v1120_v8  ;;  %v148_v11 = vpop.f32.mrb[1].mxu0 }
 0x116   :  { %v149_v12 = vadd.f32 %v1120_v8, %v148_v11 }
 0x117   :  { %v1638_v20 = vmul.f32 0.35355338, %v154_v10 }
 0x118   :  { %v1621_v13 = vpack.i.bf16 %v154_v10, %v149_v12  ;;  %v1623_v14 = vmul.f32 0.35355338, %v149_v12 }
 0x11a   :  { %1349 = vrot.lane.b32.xlu0 %v1621_v13, %s1519_s7  ;;  %1209 = vmatprep.mubr.msk.f32.mxu1 %vm181_vm1, %v1623_v14 }
 0x18c   :  { %v1350_v15 = vpop.permute.xlu0 %1349 }
 0x18d   :  { %v1352_v16 = vunpack.i.h.bf16 %v1350_v15  ;;  %v1351_v17 = vunpack.i.l.bf16 %v1350_v15 }
 0x18f   :  { %v1280_v19 = vpack.c.bf16 %v1352_v16, %v1351_v17 }
 0x191   :  { %1282 = vmatprep.subr.msk.bf16.mxu1 %vm1630_vm2, %v1280_v19 }
 0x192   :  { %1285 = vmatpush3.bf16.xpose.msk.msra.mxu1 %vm1630_vm2, %v1280_v19 }
 0x199   :  { %1210 = vmatmul.mubr.msk.f32.vlgmr.msra.gmra.mrb[0].mxu1 %vm181_vm1, %v1638_v20 }
 0x26c   :  { %v1211_v31 = vpop.f32.mrb[0].mxu1 }
 0x26d   :  { %v264_v32 = vadd.f32 %v1211_v31, %v1642_v29  ;;  %v258_v33 = vpop.f32.mrb[1].mxu1 }
 0x26e   :  { %v259_v34 = vadd.f32 %v258_v33, %v1644_v30 }
 0x26f   :  { %v271_v35 = vsel %vm267_vm9, %v264_v32, -inf }
 0x270   :  { %272 = vmax.xlane.f32.xlu1 %v271_v35  ;;  %v268_v36 = vsel %vm267_vm9, %v259_v34, -inf }
 0x271   :  { %269 = vmax.xlane.f32.xlu0 %v268_v36 }
 0x281   :  { %1354 = vrot.lane.b32.xlu1 %v1621_v13, %s1521_s2 }
 0x285   :  { %1359 = vrot.lane.b32.xlu1 %v1621_v13, %s1522_s8 }
 0x287   :  { %379 = vrot.lane.b32.xlu0 %v1638_v20, %s1523_s9 }
 0x2fd   :  { %v273_v37 = vpop.xlane.xlu1 %272 }
 0x2fe   :  { %v275_v38 = vsub.f32 %v264_v32, %v273_v37  ;;  %v270_v39 = vpop.xlane.xlu0 %269 }
 0x2ff   :  { %v274_v40 = vsub.f32 %v259_v34, %v270_v39 }
 0x300   :  { %v278_v41 = vmul.f32 1.442695, %v275_v38 }
 0x301   :  { %v276_v42 = vmul.f32 1.442695, %v274_v40  ;;  %v1355_v43 = vpop.permute.xlu1 %1354 }
 0x302   :  { %1388 = vpow2.f32 %v278_v41  ;;  %v1357_v44 = vunpack.i.h.bf16 %v1355_v43  ;;  %v1356_v45 = vunpack.i.l.bf16 %v1355_v43  ;;  %v380_v62 = vpop.permute.xlu0 %379 }
 0x303   :  { %1390 = vpow2.f32 %v276_v42 }
 0x304   :  { %v1286_v46 = vpack.c.bf16 %v1357_v44, %v1356_v45 }
 0x305   :  { %v1360_v47 = vpop.permute.xlu1 %1359 }
 0x306   :  { %v1362_v48 = vunpack.i.h.bf16 %v1360_v47  ;;  %v1361_v49 = vunpack.i.l.bf16 %v1360_v47  ;;  %1287 = vmatprep.subr.bf16.mxu1 %v1286_v46 }
 0x307   :  { %1289 = vmatpush3.bf16.msra.mxu1 %v1286_v46 }
 0x308   :  { %v1290_v50 = vpack.c.bf16 %v1362_v48, %v1361_v49 }
 0x30a   :  { %1292 = vmatprep.subr.msk.bf16.mxu1 %vm1630_vm2, %v1290_v50 }
 0x30c   :  { %v1389_v51 = vpop.eup %1388 }
 0x30d   :  { %v283_v52 = vsel %vm267_vm9, %v1389_v51, 0.0  ;;  %v1391_v53 = vpop.eup %1390 }
 0x30e   :  { %284 = vadd.xlane.f32.xlu1 %v283_v52  ;;  %v280_v54 = vsel %vm267_vm9, %v1391_v53, 0.0 }
 0x312   :  { %281 = vadd.xlane.f32.xlu1 %v280_v54 }
 0x323   :  { %377 = vrot.lane.b32.xlu1 %v1623_v14, %s1523_s9 }
 0x39b   :  { %v285_v55 = vpop.xlane.xlu1 %284 }
 0x39c   :  { %1392 = vrcp.f32 %v285_v55 }
 0x39f   :  { %v282_v56 = vpop.xlane.xlu1 %281 }
 0x3a0   :  { %1394 = vrcp.f32 %v282_v56 }
 0x3a3   :  { %v378_v61 = vpop.permute.xlu1 %377 }
 0x3a6   :  { %v1393_v57 = vpop.eup %1392 }
 0x3a7   :  { %v289_v60 = vmul.f32 %v1393_v57, %v1389_v51 }
 0x3aa   :  { %v1395_v58 = vpop.eup %1394 }
 0x3ab   :  { %v288_v59 = vmul.f32 %v1395_v58, %v1391_v53 }
 0x3ad   :  { %1216 = vmatprep.mubr.msk.f32.mxu1 %vm267_vm9, %v288_v59 }
 0x3ae   :  { %1217 = vmatmul.mubr.msk.f32.vlgmr.msra.gmra.mrb[2].mxu1 %vm267_vm9, %v289_v60 }
 0x3af   :  { %1295 = vmatpush3.bf16.xpose.msk.msra.mxu1 %vm1630_vm2, %v1290_v50  ;;  %1223 = vmatprep.mubr.msk.f32.mxu1 %vm181_vm1, %v378_v61 }
 0x3b6   :  { %1224 = vmatmul.mubr.msk.f32.vlgmr.msra.gmra.mrb[4].mxu1 %vm181_vm1, %v380_v62 }
 0x481   :  { %v1664_v63 = vpop.f32.mrb[2].mxu1 }
 0x482   :  { %v1666_v0 = vpop.f32.mrb[3].mxu1 }
 0x489   :  { %v1225_v1 = vpop.f32.mrb[4].mxu1 }
 0x48a   :  { %v465_v2 = vadd.f32 %v1225_v1, %v1642_v29  ;;  %v459_v3 = vpop.f32.mrb[5].mxu1 }
 0x48b   :  { %v460_v4 = vadd.f32 %v459_v3, %v1644_v30 }
 0x48c   :  { %v471_v5 = vsel %vm267_vm9, %v465_v2, -inf }
 0x48d   :  { %472 = vmax.xlane.f32.xlu0 %v471_v5  ;;  %v468_v6 = vsel %vm267_vm9, %v460_v4, -inf }
 0x48e   :  { %469 = vmax.xlane.f32.xlu1 %v468_v6 }
 0x49f   :  { %1364 = vrot.lane.b32.xlu1 %v1621_v13, %s1524_s10 }
 0x4a3   :  { %1369 = vrot.lane.b32.xlu0 %v1621_v13, %s1525_s11  ;;  %577 = vrot.lane.b32.xlu1 %v1623_v14, %s1526_s12 }
 0x51a   :  { %v473_v7 = vpop.xlane.xlu0 %472 }
 0x51b   :  { %v475_v8 = vsub.f32 %v465_v2, %v473_v7  ;;  %v470_v9 = vpop.xlane.xlu1 %469 }
 0x51c   :  { %v474_v10 = vsub.f32 %v460_v4, %v470_v9 }
 0x51d   :  { %v478_v11 = vmul.f32 1.442695, %v475_v8 }
 0x51e   :  { %v476_v12 = vmul.f32 1.442695, %v474_v10  ;;  %v1370_v15 = vpop.permute.xlu0 %1369 }
 0x51f   :  { %1396 = vpow2.f32 %v478_v11  ;;  %v1365_v16 = vpop.permute.xlu1 %1364  ;;  %v1372_v17 = vunpack.i.h.bf16 %v1370_v15  ;;  %v1371_v19 = vunpack.i.l.bf16 %v1370_v15 }
 0x520   :  { %v1367_v21 = vunpack.i.h.bf16 %v1365_v16  ;;  %v1366_v22 = vunpack.i.l.bf16 %v1365_v16  ;;  %1398 = vpow2.f32 %v476_v12 }
 0x521   :  { %v1300_v24 = vpack.c.bf16 %v1372_v17, %v1371_v19 }
 0x522   :  { %v1296_v23 = vpack.c.bf16 %v1367_v21, %v1366_v22 }
 0x523   :  { %v578_v31 = vpop.permute.xlu1 %577 }
 0x524   :  { %1297 = vmatprep.subr.bf16.mxu0 %v1296_v23 }
 0x525   :  { %1299 = vmatpush3.bf16.msra.mxu0 %v1296_v23 }
 0x526   :  { %1302 = vmatprep.subr.msk.bf16.mxu0 %vm1630_vm2, %v1300_v24 }
 0x529   :  { %v1397_v25 = vpop.eup %1396 }
 0x52a   :  { %v483_v26 = vsel %vm267_vm9, %v1397_v25, 0.0  ;;  %v1399_v27 = vpop.eup %1398 }
 0x52b   :  { %484 = vadd.xlane.f32.xlu1 %v483_v26  ;;  %v480_v28 = vsel %vm267_vm9, %v1399_v27, 0.0 }
 0x52f   :  { %481 = vadd.xlane.f32.xlu1 %v480_v28 }
 0x540   :  { %579 = vrot.lane.b32.xlu1 %v1638_v20, %s1526_s12 }
 0x5b8   :  { %v485_v32 = vpop.xlane.xlu1 %484 }
 0x5b9   :  { %1400 = vrcp.f32 %v485_v32 }
 0x5bc   :  { %v482_v33 = vpop.xlane.xlu1 %481 }
 0x5bd   :  { %1402 = vrcp.f32 %v482_v33 }
 0x5c0   :  { %v580_v38 = vpop.permute.xlu1 %579 }
 0x5c3   :  { %v1401_v34 = vpop.eup %1400 }
 0x5c4   :  { %v489_v37 = vmul.f32 %v1401_v34, %v1397_v25 }
 0x5c7   :  { %v1403_v35 = vpop.eup %1402 }
 0x5c8   :  { %v488_v36 = vmul.f32 %v1403_v35, %v1399_v27 }
 0x5ca   :  { %1230 = vmatprep.mubr.msk.f32.mxu0 %vm267_vm9, %v488_v36 }
 0x5cb   :  { %1231 = vmatmul.mubr.msk.f32.vlgmr.msra.gmra.mrb[2].mxu0 %vm267_vm9, %v489_v37 }
 0x5cc   :  { %1305 = vmatpush3.bf16.xpose.msk.msra.mxu0 %vm1630_vm2, %v1300_v24  ;;  %1237 = vmatprep.mubr.msk.f32.mxu0 %vm181_vm1, %v578_v31 }
 0x5d3   :  { %1238 = vmatmul.mubr.msk.f32.vlgmr.msra.gmra.mrb[4].mxu0 %vm181_vm1, %v580_v38 }
 0x69e   :  { %v1686_v39 = vpop.f32.mrb[2].mxu0 }
 0x69f   :  { %v1688_v40 = vpop.f32.mrb[3].mxu0 }
 0x6a6   :  { %v1239_v41 = vpop.f32.mrb[4].mxu0 }
 0x6a7   :  { %v665_v42 = vadd.f32 %v1239_v41, %v1642_v29  ;;  %v659_v43 = vpop.f32.mrb[5].mxu0  ;;  %v1010_v41 = vld [vmem:[#allocation7 + $0x10] sm:$0xff] }
 0x6a8   :  { %v660_v44 = vadd.f32 %v659_v43, %v1644_v30  ;;  %v1011_v43 = vld [vmem:[#allocation7 + $0x18] sm:$0xff] }
 0x6a9   :  { %v671_v45 = vsel %vm267_vm9, %v665_v42, -inf }
 0x6aa   :  { %672 = vmax.xlane.f32.xlu0 %v671_v45  ;;  %v668_v46 = vsel %vm267_vm9, %v660_v44, -inf }
 0x6ab   :  { %669 = vmax.xlane.f32.xlu1 %v668_v46 }
 0x737   :  { %v673_v47 = vpop.xlane.xlu0 %672 }
 0x738   :  { %v675_v48 = vsub.f32 %v665_v42, %v673_v47  ;;  %v670_v49 = vpop.xlane.xlu1 %669 }
 0x739   :  { %v674_v50 = vsub.f32 %v660_v44, %v670_v49  ;;  %v1324_v44 = vpack.c.bf16 %v1011_v43, %v1010_v41 }
 0x73a   :  { %v678_v51 = vmul.f32 1.442695, %v675_v48 }
 0x73b   :  { %v676_v52 = vmul.f32 1.442695, %v674_v50 }
 0x73c   :  { %1404 = vpow2.f32 %v678_v51 }
 0x73d   :  { %1406 = vpow2.f32 %v676_v52 }
 0x746   :  { %v1405_v53 = vpop.eup %1404 }
 0x747   :  { %v1407_v54 = vpop.eup %1406  ;;  %v683_v55 = vsel %vm267_vm9, %v1405_v53, 0.0 }
 0x748   :  { %684 = vadd.xlane.f32.xlu1 %v683_v55  ;;  %v680_v56 = vsel %vm267_vm9, %v1407_v54, 0.0 }
 0x749   :  { %681 = vadd.xlane.f32.xlu0 %v680_v56 }
 0x759   :  { %1379 = vrot.lane.b32.xlu1 %v1621_v13, %s1527_s13 }
 0x75d   :  { %777 = vrot.lane.b32.xlu1 %v1623_v14, %s1528_s14 }
 0x75f   :  { %1374 = vrot.lane.b32.xlu0 %v1621_v13, %s1529_s15 }
 0x763   :  { %779 = vrot.lane.b32.xlu0 %v1638_v20, %s1528_s14 }
 0x7d5   :  { %v685_v57 = vpop.xlane.xlu1 %684 }
 0x7d6   :  { %1408 = vrcp.f32 %v685_v57  ;;  %v682_v58 = vpop.xlane.xlu0 %681 }
 0x7d7   :  { %1410 = vrcp.f32 %v682_v58 }
 0x7d9   :  { %v1380_v59 = vpop.permute.xlu1 %1379 }
 0x7da   :  { %v1375_v60 = vpop.permute.xlu0 %1374  ;;  %v1382_v61 = vunpack.i.h.bf16 %v1380_v59  ;;  %v1381_v62 = vunpack.i.l.bf16 %v1380_v59  ;;  %v1147_v59 = vld [vmem:[%s1753_s4] ss:$0 sm:$0xff] }
 0x7db   :  { %v1377_v1 = vunpack.i.h.bf16 %v1375_v60  ;;  %v1376_v2 = vunpack.i.l.bf16 %v1375_v60 }
 0x7dc   :  { %v1310_v4 = vpack.c.bf16 %v1382_v61, %v1381_v62 }
 0x7dd   :  { %v1306_v3 = vpack.c.bf16 %v1377_v1, %v1376_v2  ;;  %v778_v7 = vpop.permute.xlu1 %777 }
 0x7de   :  { %v780_v8 = vpop.permute.xlu0 %779 }
 0x7df   :  { %1307 = vmatprep.subr.bf16.mxu1 %v1306_v3 }
 0x7e0   :  { %v1409_v5 = vpop.eup %1408  ;;  %1309 = vmatpush3.bf16.msra.mxu1 %v1306_v3 }
 0x7e1   :  { %v1411_v14 = vpop.eup %1410  ;;  %1312 = vmatprep.subr.msk.bf16.mxu1 %vm1630_vm2, %v1310_v4  ;;  %v689_v6 = vmul.f32 %v1409_v5, %v1405_v53 }
 0x7e2   :  { %v688_v20 = vmul.f32 %v1411_v14, %v1407_v54 }
 0x7e4   :  { %1244 = vmatprep.mubr.msk.f32.mxu1 %vm267_vm9, %v688_v20 }
 0x7e5   :  { %1245 = vmatmul.mubr.msk.f32.vlgmr.msra.gmra.mrb[6].mxu1 %vm267_vm9, %v689_v6 }
 0x7e6   :  { %1251 = vmatprep.mubr.msk.f32.mxu1 %vm181_vm1, %v778_v7 }
 0x7e9   :  { %1315 = vmatpush3.bf16.xpose.msk.msra.mxu1 %vm1630_vm2, %v1310_v4 }
 0x7f0   :  { %1252 = vmatmul.mubr.msk.f32.vlgmr.msra.gmra.mrb[8].mxu1 %vm181_vm1, %v780_v8 }
 0x8b8   :  { %v1246_v9 = vpop.f32.mrb[6].mxu1 }
 0x8b9   :  { %v768_v10 = vpop.f32.mrb[7].mxu1 }
 0x8c3   :  { %v1253_v11 = vpop.f32.mrb[8].mxu1 }
 0x8c4   :  { %v865_v12 = vadd.f32 %v1253_v11, %v1642_v29  ;;  %v859_v15 = vpop.f32.mrb[9].mxu1 }
 0x8c5   :  { %v860_v16 = vadd.f32 %v859_v15, %v1644_v30 }
 0x8c6   :  { %v871_v17 = vsel %vm267_vm9, %v865_v12, -inf }
 0x8c7   :  { %872 = vmax.xlane.f32.xlu0 %v871_v17  ;;  %v868_v19 = vsel %vm267_vm9, %v860_v16, -inf }
 0x8c8   :  { %869 = vmax.xlane.f32.xlu1 %v868_v19 }
 0x954   :  { %v873_v21 = vpop.xlane.xlu0 %872 }
 0x955   :  { %v875_v18 = vsub.f32 %v865_v12, %v873_v21  ;;  %v870_v22 = vpop.xlane.xlu1 %869 }
 0x956   :  { %v874_v23 = vsub.f32 %v860_v16, %v870_v22 }
 0x957   :  { %v878_v24 = vmul.f32 1.442695, %v875_v18 }
 0x958   :  { %v876_v25 = vmul.f32 1.442695, %v874_v23 }
 0x959   :  { %1412 = vpow2.f32 %v878_v24 }
 0x95a   :  { %1414 = vpow2.f32 %v876_v25 }
 0x963   :  { %v1413_v26 = vpop.eup %1412 }
 0x964   :  { %v1415_v27 = vpop.eup %1414  ;;  %v883_v29 = vsel %vm267_vm9, %v1413_v26, 0.0 }
 0x965   :  { %884 = vadd.xlane.f32.xlu1 %v883_v29  ;;  %v880_v30 = vsel %vm267_vm9, %v1415_v27, 0.0 }
 0x966   :  { %881 = vadd.xlane.f32.xlu0 %v880_v30 }
 0x976   :  { %979 = vrot.lane.b32.xlu1 %v1688_v40, %s1517_s6  ;;  %v1009_v40 = vld [vmem:[#allocation7 + $0x8] sm:$0xff] }
 0x97a   :  { %981 = vrot.lane.b32.xlu1 %v1686_v39, %s1517_s6 }
 0x97c   :  { %1384 = vrot.lane.b32.xlu0 %v1621_v13, %s1530_s16  ;;  %v1008_v13 = vld [vmem:[#allocation7] sm:$0xff] }
 0x97d   :  { %v1320_v42 = vpack.c.bf16 %v1009_v40, %v1008_v13 }
 0x97e   :  { %989 = vrot.lane.b32.xlu1 %v1246_v9, %s1531_s1 }
 0x980   :  { %987 = vrot.lane.b32.xlu0 %v768_v10, %s1531_s1 }
 0x9f2   :  { %v885_v28 = vpop.xlane.xlu1 %884 }
 0x9f3   :  { %1416 = vrcp.f32 %v885_v28  ;;  %v882_v31 = vpop.xlane.xlu0 %881 }
 0x9f4   :  { %1418 = vrcp.f32 %v882_v31 }
 0x9f6   :  { %v980_v47 = vpop.permute.xlu1 %979 }
 0x9f7   :  { %v1385_v32 = vpop.permute.xlu0 %1384  ;;  %v1001_v51 = vsel %vm181_vm1, %v1666_v0, %v980_v47 }
 0x9f8   :  { %v1387_v33 = vunpack.i.h.bf16 %v1385_v32  ;;  %v1386_v34 = vunpack.i.l.bf16 %v1385_v32 }
 0x9fa   :  { %v1316_v35 = vpack.c.bf16 %v1387_v33, %v1386_v34  ;;  %v982_v48 = vpop.permute.xlu1 %981 }
 0x9fb   :  { %v988_v50 = vpop.permute.xlu0 %987  ;;  %v1002_v53 = vsel %vm181_vm1, %v1664_v63, %v982_v48 }
 0x9fc   :  { %1317 = vmatprep.subr.bf16.mxu0 %v1316_v35  ;;  %v1003_v54 = vsel %vm267_vm9, %v1001_v51, %v988_v50 }
 0x9fd   :  { %v1417_v36 = vpop.eup %1416  ;;  %1319 = vmatpush3.bf16.msra.mxu0 %v1316_v35 }
 0x9fe   :  { %v1419_v37 = vpop.eup %1418  ;;  %v889_v39 = vmul.f32 %v1417_v36, %v1413_v26  ;;  %1321 = vmatprep.subr.bf16.mxu0 %v1320_v42  ;;  %v990_v49 = vpop.permute.xlu1 %989 }
 0x9ff   :  { %v888_v38 = vmul.f32 %v1419_v37, %v1415_v27  ;;  %v1004_v56 = vsel %vm267_vm9, %v1002_v53, %v990_v49 }
 0xa01   :  { %1258 = vmatprep.mubr.msk.f32.mxu0 %vm267_vm9, %v888_v38 }
 0xa02   :  { %1259 = vmatmul.mubr.msk.f32.vlgmr.msra.gmra.mrb[6].mxu0 %vm267_vm9, %v889_v39 }
 0xa03   :  { %1323 = vmatpush3.bf16.msra.mxu0 %v1320_v42 }
 0xa04   :  { %1325 = vmatprep.subr.bf16.mxu0 %v1324_v44 }
 0xa07   :  { %1327 = vmatpush3.bf16.msra.mxu0 %v1324_v44 }
 0xad5   :  { %v1260_v45 = vpop.f32.mrb[6].mxu0 }
 0xad6   :  { %997 = vrot.lane.b32.xlu1 %v1260_v45, %s1532_s17  ;;  %v968_v46 = vpop.f32.mrb[7].mxu0 }
 0xad7   :  { %995 = vrot.lane.b32.xlu0 %v968_v46, %s1532_s17 }
 0xb48   :  { %v998_v52 = vpop.permute.xlu1 %997 }
 0xb49   :  { %v996_v55 = vpop.permute.xlu0 %995  ;;  %v1007_v58 = vsel %vm1005_vm10, %v1004_v56, %v998_v52 }
 0xb4a   :  { %v1006_v57 = vsel %vm1005_vm10, %v1003_v54, %v996_v55 }
 0xb4b   :  { %1269 = vmatprep.mubr.msk.f32.mxu0 %vm75_vm0, %v1006_v57 }
 0xb4c   :  { %1270 = vmatmul.mubr.msk.f32.vlgmr.msra.gmra.mrb[8].mxu0 %vm75_vm0, %v1007_v58 }
 0xc1f   :  { %v1271_v0 = vpop.f32.mrb[8].mxu0 }
 0xc20   :  { %v1097_v60 = vadd.f32 %v1271_v0, %v1147_v59  ;;  %v1091_v63 = vpop.f32.mrb[9].mxu0 }
 0xc21   :  { %v1092_v61 = vadd.f32 %v1147_v59, %v1091_v63 }
 0xc22   :  { %1101 = vst.msk [vmem:[#allocation8 + $0x8] sm:$0xff] %vm75_vm0, %v1097_v60 }
 0xc23   :  { %1100 = vst.msk [vmem:[#allocation8] sm:$0xff] %vm75_vm0, %v1092_v61 }
 0xc24   :  { %1497 = shalt.err (!%p1494_p0)
}
 0xc25   :  { %s1498_s25 = scalar_lea.hbm %s1754_s5, 256 }
 0xc26   :  { %p1499_p1 = scmp.ne.s32.totalorder %s1754_s5, %s1498_s25  ;;  %p1502_p2 = scmp.lt.u32.totalorder %s1498_s25, %s1754_s5 }
 0xc28   :  { %p1504_p3 = pnand %p1502_p2, %p1499_p1 }
 0xc2a   :  { %1507 = shalt.err (!%p1504_p3)
}
 0xc2b   :  { %1113 = dma.vmem_to_hbm [thread:$0]  %s1108_s22, 256, %s1754_s5, [#allocation4], %s1516_s30, %s1516_s30, %s1517_s6  }
 0xc2c   :  { %1512 = dma.done.wait [#allocation4], 256  }
 0xc2d   :  { %1513 = vsyncadd [#allocation4], 4294967040 }
 0xc2e   :  { %1117 = vsyncpa [#allocation3], 1 }
 0xc2f   :  { %1118 = vsyncpa [#allocation6], 1 }
 0xc30   :  { %1119 = vsyncpa [#allocation4], 1 }

</bundles_post_ra>
